<compile_context>
chip_gen: v7x
topology: tpu7x:2x2x1
jax: 0.10.0
libtpu: 0.0.40
codegen_flags: <defaults>
</compile_context>

<pallas_src>
import jax
import jax.numpy as jnp
from jax.experimental import pallas as pl
from jax.experimental.pallas import tpu as pltpu


def _spd_expmap_kernel(u_ref, s_ref, o_ref):
    # u_ref: (BT, N, N)   eigenvectors for BT batch elements
    # s_ref: (BT, 1, N)   eigenvalues  for BT batch elements
    # o_ref: (BT, N, N)   output exp-map
    bt = u_ref.shape[0]
    for i in range(bt):                      # BT is small & static -> unrolled
        u = u_ref[i]                         # (N, N)
        # Symmetric factor: v = u * exp(s/2); scales column j of u (exp on EUP slot).
        v = u * jnp.exp(0.5 * s_ref[i])      # (N, N), broadcast of (1, N) over rows
        # v @ v^T with the transpose folded into the contraction (no XLU vxpose).
        out = jax.lax.dot_general(
            v, v,
            dimension_numbers=(((1,), (1,)), ((), ())),
            preferred_element_type=jnp.float32,
        )
        o_ref[i] = out.astype(o_ref.dtype)


def _choose_block_batch(B, N):
    """Pick how many matrices to process per grid step.

    Caps the per-step VMEM footprint (~double-buffered in/out + compute scratch,
    roughly 24*N^2 bytes per f32 matrix) at ~12 MiB so it fits the default
    scoped VMEM on v5e/v6e/v7x, and keeps >= 2 grid steps where possible so
    v7x's two TensorCores both get work.
    """
    budget_bytes = 12 * 1024 * 1024
    per_mat_bytes = 24 * N * N
    cap = max(1, budget_bytes // per_mat_bytes)
    for bt in (16, 8, 4, 2):
        if bt <= cap and B % bt == 0 and B // bt >= 2:
            return bt
    return 1


def spd_expmap(x):
    """Matrix exponential of batched symmetric (SPD) matrices x: (B, N, N)."""
    B, N, _ = x.shape
    # Eigendecomposition (glue, outside the kernel).
    s, u = jnp.linalg.eigh(x)                # s: (B, N), u: (B, N, N)
    s3 = s.reshape(B, 1, N)                  # last two dims match full array dims

    bt = _choose_block_batch(B, N)
    grid = (B // bt,)

    grid_spec = pltpu.PrefetchScalarGridSpec(
        num_scalar_prefetch=0,
        grid=grid,
        in_specs=[
            pl.BlockSpec((bt, N, N), lambda b: (b, 0, 0)),   # u
            pl.BlockSpec((bt, 1, N), lambda b: (b, 0, 0)),   # s
        ],
        out_specs=pl.BlockSpec((bt, N, N), lambda b: (b, 0, 0)),
    )

    return pl.pallas_call(
        _spd_expmap_kernel,
        out_shape=jax.ShapeDtypeStruct((B, N, N), x.dtype),
        grid_spec=grid_spec,
        compiler_params=pltpu.CompilerParams(
            dimension_semantics=("parallel",),
        ),
    )(u, s3)


def _reference(x):
    s, u = jnp.linalg.eigh(x)
    return jnp.einsum("bij,bj,bkj->bik", u, jnp.exp(s), u)


if __name__ == "__main__":
    key = jax.random.PRNGKey(0)
    B, N = 2, 32
    # Deterministic symmetric positive-definite inputs.
    g = jax.random.normal(key, (B, N, N), dtype=jnp.float32)
    x = g @ jnp.swapaxes(g, -2, -1) / N + 0.1 * jnp.eye(N, dtype=jnp.float32)[None]

    out = jax.block_until_ready(spd_expmap(x))

    ref = _reference(x)
    assert out.shape == (B, N, N)
    assert out.dtype == jnp.float32
    assert jnp.allclose(out, ref, rtol=1e-4, atol=1e-4), (
        f"max abs err = {jnp.max(jnp.abs(out - ref))}"
    )
    print("KERNEL_OK")
</pallas_src>

<mosaic_0001>
module attributes {stable_mosaic.version = 11 : i64} {
  func.func @_spd_expmap_kernel(%arg0: i32, %arg1: memref<1x32x32xf32, #tpu.memory_space<vmem>>, %arg2: memref<1x1x32xf32, #tpu.memory_space<vmem>>, %arg3: memref<1x32x32xf32, #tpu.memory_space<vmem>>) attributes {dimension_semantics = [#tpu.dimension_semantics<parallel>], iteration_bounds = array<i64: 2>, scalar_prefetch = 0 : i64, scratch_operands = 0 : i64, tpu.core_type = #tpu.core_type<tc>, window_params = [{transform_indices = @transform_0, window_bounds = array<i64: 1, 32, 32>}, {transform_indices = @transform_1, window_bounds = array<i64: 1, 1, 32>}, {transform_indices = @transform_2, window_bounds = array<i64: 1, 32, 32>}]} {
    %c0 = arith.constant 0 : index
    %c0_0 = arith.constant 0 : index
    %c0_1 = arith.constant 0 : index
    %0 = vector.load %arg1[%c0, %c0_0, %c0_1] : memref<1x32x32xf32, #tpu.memory_space<vmem>>, vector<1x32x32xf32>
    %1 = vector.shape_cast %0 : vector<1x32x32xf32> to vector<32x32xf32>
    %c0_2 = arith.constant 0 : index
    %c0_3 = arith.constant 0 : index
    %c0_4 = arith.constant 0 : index
    %2 = vector.load %arg2[%c0_2, %c0_3, %c0_4] : memref<1x1x32xf32, #tpu.memory_space<vmem>>, vector<1x1x32xf32>
    %3 = vector.shape_cast %2 : vector<1x1x32xf32> to vector<1x32xf32>
    %cst = arith.constant 5.000000e-01 : f32
    %4 = vector.broadcast %cst : f32 to vector<1x32xf32>
    %5 = arith.mulf %4, %3 : vector<1x32xf32>
    %6 = math.exp %5 : vector<1x32xf32>
    %7 = vector.broadcast %6 : vector<1x32xf32> to vector<32x32xf32>
    %8 = arith.mulf %1, %7 : vector<32x32xf32>
    %cst_5 = arith.constant dense<0.000000e+00> : vector<32x32xf32>
    %9 = tpu.matmul %8, %8, %cst_5 {dimension_numbers = #tpu.dot_dimension_numbers<[1], [1], [0], [0], [0, 0, 1, 0], [], []>} : vector<32x32xf32>, vector<32x32xf32>, vector<32x32xf32> -> vector<32x32xf32>
    %c0_6 = arith.constant 0 : index
    %c0_7 = arith.constant 0 : index
    %c0_8 = arith.constant 0 : index
    %10 = vector.load %arg3[%c0_6, %c0_7, %c0_8] : memref<1x32x32xf32, #tpu.memory_space<vmem>>, vector<1x32x32xf32>
    %11 = vector.shape_cast %10 : vector<1x32x32xf32> to vector<32x32xf32>
    %12 = vector.shape_cast %9 : vector<32x32xf32> to vector<1x32x32xf32>
    tpu.vector_store %arg3[%c0_6, %c0_7, %c0_8], %12 {strides = array<i32>} : memref<1x32x32xf32, #tpu.memory_space<vmem>>, vector<1x32x32xf32>,
    return
  }
  func.func @transform_0(%arg0: i32) -> (i32, i32, i32) {
    %c0_i32 = arith.constant 0 : i32
    %c0_i32_0 = arith.constant 0 : i32
    %c0_i32_1 = arith.constant 0 : i32
    return %arg0, %c0_i32, %c0_i32_0 : i32, i32, i32
  }
  func.func @transform_1(%arg0: i32) -> (i32, i32, i32) {
    %c0_i32 = arith.constant 0 : i32
    %c0_i32_0 = arith.constant 0 : i32
    %c0_i32_1 = arith.constant 0 : i32
    return %arg0, %c0_i32, %c0_i32_0 : i32, i32, i32
  }
  func.func @transform_2(%arg0: i32) -> (i32, i32, i32) {
    %c0_i32 = arith.constant 0 : i32
    %c0_i32_0 = arith.constant 0 : i32
    %c0_i32_1 = arith.constant 0 : i32
    return %arg0, %c0_i32, %c0_i32_0 : i32, i32, i32
  }
}

</mosaic_0001>

<bundles_post_ra>
// kernel: tpu_custom_call.1
= control target key start
LH: loop header
LB: loop body
LE: loop exit
PB: predicated region body
PF: predicated region fallthrough
CT: control target
= control target key end

     0   :  { %7 = vsyncpa [#allocation3], 0  ;;  %s806_s0 = inlined_call_operand.hbm [shape: f32[2,32,32], index: 0, kind: input, shape index: {}]   ;;  %s807_s1 = inlined_call_operand.vmem [shape: f32[2,1,32], index: 1, kind: input, shape index: {}]   ;;  %s808_s2 = inlined_call_operand.hbm [shape: f32[2,32,32], index: 2, kind: output, shape index: {}]  }
   0x1   :  { %9 = vsyncpa [#allocation3 + $0x1], 0 }
   0x2   :  { %10 = vsyncpa [#allocation4], 0 }
   0x3   :  { %12 = vsyncpa [#allocation4 + $0x1], 0  ;;  %s625_s9 = smov 0   ;;  %s627_s10 = smov 0  }
   0x4   :  { %s629_s11 = smov 0   ;;  %s631_s12 = smov 0  }
   0x5 LB: > { %s646_s13 = sadd.s32 4294967295, %s602_s12   ;;  %s392_s14 = sadd.s32 4294967294, %s602_s12   ;;  %s602_s12 = sphi %s631_s12, %s821_s12   ;;  %s598_s11 = sphi %s629_s11, %s820_s11   ;;  %s594_s10 = sphi %s627_s10, %s819_s10   ;;  %s590_s9 = sphi %s625_s9, %s818_s9  }
   0x6   : > { %s650_s15 = sadd.s32 1, %s602_s12   ;;  %s25_s16 = sadd.s32 1, %s598_s11 }
   0x7   : > { %s22_s17 = ssub.s32 %s602_s12, %s650_s15  ;;  %p32_p0 = scmp.ne.s32.totalorder %s598_s11, %s594_s10 }
   0x8   : > { %p23_p1 = scmp.eq.s32.totalorder %s22_s17, 0  ;;  %p33_p2 = scmp.eq.s32.totalorder %s602_s12, 0 }
   0x9   : > { %p38_p3 = scmp.ne.s32.totalorder %s594_s10, %s590_s9  ;;  %p39_p4 = scmp.eq.s32.totalorder %s646_s13, 0 }
   0xa   : > { %s662_s18 = scalar_select %p23_p1, %s598_s11, %s25_s16  }
   0xb   : > { %p664_p5 = por %p33_p2, %p32_p0  ;;  %p668_p6 = por %p39_p4, %p38_p3 }
   0xc   : > { %p88_p7 = scmp.eq.s32.totalorder %s646_s13, 1  ;;  %p94_p8 = scmp.eq.s32.totalorder %s392_s14, 1 }
   0xd   : > { %p466_p10 = scmp.lt.s32.totalorder %s602_s12, 2  ;;  %s114_s23 = sand.u32 1, %s598_s11  }
   0xe   : > { %p675_p11 = por %p88_p7, %p32_p0  ;;  %p679_p12 = por %p94_p8, %p38_p3 }
   0xf   : > { %s414_s24 = sshll.u32 %s602_s12, 9  ;;  %s395_s25 = sshll.u32 %s114_s23, 5 }
  0x10   : > { %s812_s21 = scalar_select %p675_p11, 1, 0 }
  0x11   : > { %s813_s22 = scalar_select %p679_p12, 1, 0 }
  0x12   : > { %s688_s28 = scalar_lea.hbm %s806_s0, %s414_s24  ;;  %s118_s29 = scalar_lea.vmem [#allocation2], %s395_s25 }
  0x13   : > { %s125_s30 = sshll.u32 %s118_s29, 4  ;;  %p692_p13 = pnand %p466_p10, %p664_p5  ;;  %s696_s30 = int_to_ptr.vmem [resolvable:$true] %s125_s30 }
  0x14   : > { %s698_s4 = scalar_lea.sflag [#allocation3], %s114_s23  ;;  %s506_s5 = scalar_lea.hbm %s688_s28, 512 }
  0x15   : > { %p507_p0 = scmp.ne.s32.totalorder %s688_s28, %s506_s5  ;;  %p508_p1 = pneg %p692_p13 }
  0x16   : > { %s511_s8 = scalar_lea.hbm %s806_s0, 1024  ;;  %p512_p4 = scmp.lt.u32.totalorder %s688_s28, %s806_s0 }
  0x17   : > { %p509_p2 = pnand %p508_p1, %p507_p0  ;;  %p513_p5 = scmp.lt.u32.totalorder %s511_s8, %s506_s5 }
  0x18   : > { %p515_p8 = scmp.lt.u32.totalorder %s506_s5, %s688_s28 }
  0x19   : > { %p510_p3 = pneg %p509_p2  ;;  %p514_p7 = por %p513_p5, %p512_p4 }
  0x1b   : > { %p516_p10 = por %p515_p8, %p514_p7 }
  0x1d   : > { %p517_p9 = pnand %p516_p10, %p510_p3 }
  0x1f   : > { %520 = shalt.err (!%p517_p9)
}
  0x20   : > { %s521_s17 = scalar_lea.vmem %s696_s30, 512  ;;  %s604_s19 = smov [#allocation2]  }
  0x21   : > { %p522_p0 = scmp.ne.s32.totalorder %s696_s30, %s521_s17  ;;  %s526_s23 = sshll.u32 %s604_s19, 4  ;;  %s527_s23 = int_to_ptr.vmem [resolvable:$false] %s526_s23 }
  0x22   : > { %s528_s24 = scalar_lea.vmem %s527_s23, 1024  ;;  %p529_p11 = scmp.lt.s32.totalorder %s696_s30, %s527_s23 }
  0x23   : > { %p524_p2 = pnand %p522_p0, %p508_p1  ;;  %p530_p4 = scmp.lt.s32.totalorder %s528_s24, %s521_s17 }
  0x25   : > { %p525_p12 = pneg %p524_p2  ;;  %p531_p5 = por %p530_p4, %p529_p11 }
  0x27   : > { %p532_p7 = pnand %p531_p5, %p525_p12 }
  0x29   : > { %535 = shalt.err (!%p532_p7)
}
  0x2a   : > { %s605_s25 = smov 128   ;;  %s606_s26 = smov 8  }
  0x2b   : > { %461 = dma.hbm_to_vmem [thread:$0]  (!%p692_p13), %s688_s28, 512, %s696_s30, %s698_s4, %s605_s25, %s605_s25, %s606_s26  }
  0x2c   : > { %p398_p9 = scmp.ge.s32.totalorder %s602_s12, 1  ;;  %p139_p1 = scmp.lt.s32.totalorder %s602_s12, 3 }
  0x2e   : > { %p140_p3 = pnand %p398_p9, %p139_p1 }
  0x2f   : > { %s729_s27 = sand.u32 (!%p140_p3), 1, %s594_s10  }
  0x30   : > { %143 = sbr.rel (%p140_p3) target bundleno = 327 (0x147), region = 28  ;;  %s399_s29 = sshll.u32 (!%p140_p3), %s729_s27, 5 }
  0x31   : > { %s146_s5 = scalar_lea.sflag (!%p140_p3), [#allocation3], %s729_s27  ;;  %s149_s6 = scalar_lea.vmem (!%p140_p3), [#allocation2], %s399_s29 }
  0x37   : > { %581 = dma.done.wait (%p668_p6), %s146_s5, 512  }
  0x38   : > { %583 = vsyncadd (%p668_p6), %s146_s5, 4294966784  ;;  %p173_p11 = scmp.lt.s32.totalorder %s646_s13, 1  ;;  %v185_v3 = vlaneseq  ;;  %v176_v6 = vld [vmem:[%s149_s6] sm:$0xff]  ;;  %v177_v8 = vld [vmem:[%s149_s6 + $0x8] sm:$0xff]  ;;  %vm194_vm0 = vcmask 261120   ;;  %s172_s20 = scalar_lea.vmem [#allocation5], %s399_s29 }
  0x39   : > { %v178_v9 = vld [vmem:[%s149_s6 + $0x10] sm:$0xff]  ;;  %v179_v10 = vld [vmem:[%s149_s6 + $0x18] sm:$0xff]  ;;  %vm439_vm1 = vmpackc.low %vm194_vm0, %vm194_vm0  ;;  %s310_s7 = sshll.u32 %s172_s20, 4  ;;  %s415_s8 = sshll.u32 %s646_s13, 9  ;;  %s753_s7 = int_to_ptr.vmem [resolvable:$true] %s310_s7 }
  0x3a   : > { %s174_s28 = scalar_select %p173_p11, %s646_s13, 1  ;;  %v186_v4 = vshrl.u32 %v185_v3, 7 }
  0x3b   : > { %s758_s17 = scalar_lea.hbm %s808_s2, %s415_s8  ;;  %s297_s13 = scalar_lea.sflag [#allocation4], %s729_s27 }
  0x3c   : > { %s175_s4 = scalar_lea.vmem %s807_s1, %s174_s28  ;;  %v187_v5 = vsub.s32 0, %v186_v4  ;;  %s536_s19 = scalar_lea.vmem %s753_s7, 512 }
  0x3d   : > { %v180_v0 = vld [vmem:[%s175_s4] sm:$0x1]  ;;  %p537_p6 = scmp.ne.s32.totalorder %s753_s7, %s536_s19  ;;  %p815_p12 = scmp.ne.s32.totalorder %s812_s21, 0 }
  0x3e   : > { %v181_v1 = vmul.f32 0.5, %v180_v0  ;;  %s607_s23 = smov [#allocation5]  }
  0x3f   : > { %p538_p13 = pnand %p537_p6, %p815_p12  ;;  %s540_s24 = sshll.u32 %s607_s23, 4  ;;  %s541_s24 = int_to_ptr.vmem [resolvable:$false] %s540_s24 }
  0x40   : > { %v182_v2 = vmul.f32 1.442695, %v181_v1  ;;  %s542_s25 = scalar_lea.vmem %s541_s24, 1024  ;;  %p543_p10 = scmp.lt.s32.totalorder %s753_s7, %s541_s24 }
  0x41   : > { %p539_p8 = pneg %p538_p13  ;;  %p544_p0 = scmp.lt.s32.totalorder %s542_s25, %s536_s19 }
  0x42   : > { %504 = vpow2.f32 %v182_v2 }
  0x43   : > { %p545_p2 = por %p544_p0, %p543_p10 }
  0x45   : > { %p546_p4 = pnand %p545_p2, %p539_p8 }
  0x4c   : > { %v505_v7 = vpop.eup %504 }
  0x4d   : > { %v188_v11 = vrot.slane %v505_v7, %v187_v5 }
  0x4f   : > { %v190_v12 = vmul.f32 %v188_v11, %v176_v6  ;;  %v191_v13 = vmul.f32 %v188_v11, %v177_v8  ;;  %v192_v14 = vmul.f32 %v188_v11, %v178_v9  ;;  %v193_v15 = vmul.f32 %v188_v11, %v179_v10 }
  0x51   : > { %v438_v16 = vpack.c.bf16 %v191_v13, %v190_v12  ;;  %v444_v17 = vpack.c.bf16 %v193_v15, %v192_v14  ;;  %432 = vmatprep.mubr.msk.f32.mxu0 %vm194_vm0, %v190_v12  ;;  %435 = vmatprep.mubr.msk.f32.mxu1 %vm194_vm0, %v192_v14 }
  0x53   : > { %440 = vmatprep.subr.msk.bf16.mxu0 %vm439_vm1, %v438_v16  ;;  %450 = vmatprep.subr.msk.bf16.mxu1 %vm439_vm1, %v438_v16 }
  0x54   : > { %443 = vmatpush3.bf16.xpose.msk.msra.mxu0 %vm439_vm1, %v438_v16  ;;  %452 = vmatpush3.bf16.xpose.msk.msra.mxu1 %vm439_vm1, %v438_v16 }
  0x55   : > { %446 = vmatprep.subr.msk.bf16.mxu0 %vm439_vm1, %v444_v17  ;;  %451 = vmatprep.subr.msk.bf16.mxu1 %vm439_vm1, %v444_v17 }
  0x5c   : > { %449 = vmatpush3.bf16.xpose.msk.msra.mxu0 %vm439_vm1, %v444_v17  ;;  %453 = vmatpush3.bf16.xpose.msk.msra.mxu1 %vm439_vm1, %v444_v17 }
  0x63   : > { %433 = vmatmul.mubr.msk.f32.vlgmr.msra.gmra.mrb[0].mxu0 %vm194_vm0, %v191_v13  ;;  %436 = vmatmul.mubr.msk.f32.vlgmr.msra.gmra.mrb[0].mxu1 %vm194_vm0, %v193_v15 }
 0x136   : > { %v434_v18 = vpop.f32.mrb[0].mxu0  ;;  %v437_v19 = vpop.f32.mrb[0].mxu1 }
 0x137   : > { %293 = vst.msk [vmem:[%s172_s20 + $0x8] sm:$0xff] %vm194_vm0, %v434_v18  ;;  %295 = vst.msk [vmem:[%s172_s20 + $0x18] sm:$0xff] %vm194_vm0, %v437_v19  ;;  %v273_v20 = vpop.f32.mrb[1].mxu0  ;;  %v283_v21 = vpop.f32.mrb[1].mxu1 }
 0x138   : > { %292 = vst.msk [vmem:[%s172_s20] sm:$0xff] %vm194_vm0, %v273_v20  ;;  %294 = vst.msk [vmem:[%s172_s20 + $0x10] sm:$0xff] %vm194_vm0, %v283_v21 }
 0x139   : > { %549 = shalt.err (!%p546_p4)
}
 0x13a   : > { %s550_s26 = scalar_lea.hbm %s758_s17, 512  ;;  %s554_s6 = scalar_lea.hbm %s808_s2, 1024 }
 0x13b   : > { %p551_p5 = scmp.ne.s32.totalorder %s758_s17, %s550_s26  ;;  %p555_p1 = scmp.lt.u32.totalorder %s758_s17, %s808_s2 }
 0x13c   : > { %p556_p3 = scmp.lt.u32.totalorder %s554_s6, %s550_s26  ;;  %p558_p6 = scmp.lt.u32.totalorder %s550_s26, %s758_s17 }
 0x13d   : > { %p552_p7 = pnand %p551_p5, %p815_p12 }
 0x13e   : > { %p557_p11 = por %p556_p3, %p555_p1 }
 0x13f   : > { %p553_p9 = pneg %p552_p7 }
 0x140   : > { %p559_p13 = por %p558_p6, %p557_p11 }
 0x142   : > { %p560_p8 = pnand %p559_p13, %p553_p9 }
 0x144   : > { %563 = shalt.err (!%p560_p8)
}
 0x145   : > { %s608_s3 = smov 128   ;;  %s609_s4 = smov 8  }
 0x146   : > { %456 = dma.vmem_to_hbm [thread:$0]  (%p815_p12), %s753_s7, 512, %s758_s17, %s297_s13, %s608_s3, %s608_s3, %s609_s4  }
 0x147 PF: > { %s325_s20 = sand.u32 1, %s590_s9   ;;  %p816_p10 = scmp.ne.s32.totalorder %s813_s22, 0 }
 0x148   : > { %p817_p0 = scmp.ge.s32.totalorder %s602_s12, 2  ;;  %s326_s8 = scalar_lea.sflag [#allocation4], %s325_s20 }
 0x14a   : > { %p463_p2 = pnand %p817_p0, %p816_p10 }
 0x14c   : > { %585 = dma.done.wait (!%p463_p2), %s326_s8, 512  }
 0x14d   : > { %587 = vsyncadd (!%p463_p2), %s326_s8, 4294966784  ;;  %p15_p4 = scmp.ge.s32.totalorder %s650_s15, 4   ;;  %s818_s9 = smov %s594_s10 }
 0x14e   : > { %s819_s10 = smov %s598_s11  ;;  %s820_s11 = smov %s662_s18 }
 0x14f   : > { %s821_s12 = smov %s650_s15  ;;  %17 = sbr.rel (!%p15_p4) target bundleno = 5 (0x5), region = 76 }
 0x156   :  { %331 = vsyncpa [#allocation3], 1 }
 0x157   :  { %333 = vsyncpa [#allocation3 + $0x1], 1 }
 0x158   :  { %334 = vsyncpa [#allocation4], 1 }
 0x159   :  { %336 = vsyncpa [#allocation4 + $0x1], 1 }

</bundles_post_ra>
